<compile_context>
chip_gen: v6e
topology: v6e:2x2x1
jax: 0.10.0
libtpu: 0.0.40
codegen_flags: <defaults>
</compile_context>

<pallas_src>
import functools

import jax
import jax.numpy as jnp
import numpy as np
from jax import lax
from jax.experimental import pallas as pl
from jax.experimental.pallas import tpu as pltpu


# ---------------------------------------------------------------------------
# Kernel
# ---------------------------------------------------------------------------
def _hard_binary_conv_kernel(x_ref, w_ref, m_ref, o_ref, xs_ref, col_ref, os_ref,
                             *, shifts, sign_mode, inv_temp, cdtype):
    """Per grid step (one batch block of nb images, S = H*W on lanes):

       x_ref : (nb, Cin, S)       activations
       w_ref : (Cout, kk*Cin)     raw weights (binarized here), constant block
       m_ref : (kk*Cin, nb*S)     {0,1} boundary masks (conv zero padding), constant
       o_ref : (nb, Cout, S)      output
       xs_ref: (Cin, nb*S)        batch-on-lanes activation slab        (scratch)
       col_ref:(kk*Cin, nb*S)     im2col slab                           (scratch)
       os_ref: (Cout, nb*S) f32   matmul result staging                 (scratch)
    """
    nb, cin, s = x_ref.shape
    L = nb * s

    # Weight binarization (eval branch of the module), fused on the tiny weight tile.
    w = w_ref[...]
    bw = jnp.sign(w) if sign_mode else jnp.clip(w * inv_temp, -1.0, 1.0)
    bw = bw.astype(cdtype)

    # 1) Fold batch onto lanes: (nb, Cin, S) -> (Cin, nb*S).  Lane-dense copies at
    #    multiples of S (S is a multiple of 128 for the intended shapes).
    for b in range(nb):
        xs_ref[:, pl.ds(b * s, s)] = x_ref[b].astype(cdtype)

    # 2) im2col: k*k static lane rolls (XLU) + boundary-mask multiplies, shared across
    #    the whole batch block; each tap streams straight into the col scratch, so live
    #    ranges stay bounded.  Masks zero both the conv padding and every roll wrap
    #    across image / block boundaries.
    for t, sh in enumerate(shifts):
        xsv = xs_ref[...]
        xt = xsv if sh % L == 0 else pltpu.roll(xsv, (-sh) % L, axis=1)
        rows = pl.ds(t * cin, cin)                       # static, cin-aligned row block
        col_ref[rows, :] = xt * m_ref[rows, :]

    # 3) ONE wide MXU matmul per grid step: (Cout, K) @ (K, nb*S), f32 accumulation.
    os_ref[...] = jnp.dot(bw, col_ref[...], preferred_element_type=jnp.float32)

    # 4) Lane-dense stores back to the (nb, Cout, S) output block.
    for b in range(nb):
        o_ref[b] = os_ref[:, pl.ds(b * s, s)].astype(o_ref.dtype)


# ---------------------------------------------------------------------------
# Block sizing (per-generation VMEM aware)
# ---------------------------------------------------------------------------
def _vmem_capacity_bytes():
    try:
        return int(pltpu.get_tpu_info().vmem_capacity_bytes)   # 128 MiB v5e/v6e, 64 MiB v7x
    except Exception:                                          # pragma: no cover
        return 64 << 20


def _pick_batch_block(n, cin, cout, kk, s, in_bytes, c_bytes):
    cap = _vmem_capacity_bytes()
    budget = cap // 4                                          # headroom for double buffers
    per_image = s * (2 * cin * in_bytes        # x block (double-buffered)
                     + 2 * cout * in_bytes     # out block (double-buffered)
                     + 2 * kk * cin * c_bytes  # mask block
                     + cin * c_bytes           # xs scratch
                     + kk * cin * c_bytes      # col scratch
                     + cout * 4)               # f32 result scratch
    const = 2 * cout * kk * cin * 4            # weight block
    nb = max(1, (budget - const) // max(per_image, 1))
    if n >= 2:
        nb = min(nb, n // 2)                   # >= 2 grid steps -> v7x megacore has work
    nb = max(1, min(nb, n))
    while n % nb:                              # keep blocks exact (no partial blocks)
        nb -= 1
    need = const + nb * per_image
    vmem_limit = int(min(cap * 9 // 10, max(2 * need + (4 << 20), 32 << 20)))
    return int(nb), vmem_limit


# ---------------------------------------------------------------------------
# Wrapper
# ---------------------------------------------------------------------------
@functools.partial(jax.jit,
                   static_argnames=("temperature", "stride", "groups", "compute_dtype"))
def hard_binary_conv(x_nchw, weight, *, temperature=1.0, stride=1, groups=1,
                     compute_dtype=jnp.float32):
    """Eval-mode HardBinaryConv forward: conv2d(x, binarize(weight), padding=k//2).

    x_nchw: (N, Cin, H, W), weight: (Cout, Cin, k, k), temperature: concrete buffer value.
    compute_dtype: MXU operand dtype (f32 default; bf16 is exact for the sign branch).
    """
    if stride != 1 or groups != 1:
        # TODO(synk): strided / grouped HardBinaryConv variants not implemented.
        raise NotImplementedError("only stride=1, groups=1 (module defaults)")

    n, cin, h, w = x_nchw.shape
    cout, cin_w, kh, kw = weight.shape
    assert cin_w == cin and kh == kw and kh % 2 == 1, "square odd kernel, matching Cin"
    k, pad, s, kk = kh, kh // 2, h * w, kh * kw

    t = float(temperature)
    sign_mode = t < 1e-7
    inv_temp = 1.0 / max(t, 1e-8)

    cdtype = jnp.dtype(compute_dtype)
    in_bytes = jnp.dtype(x_nchw.dtype).itemsize
    nb, vmem_limit = _pick_batch_block(n, cin, cout, kk, s, in_bytes, cdtype.itemsize)

    # Raw weights, tap-major / cin-minor to match the im2col row order (binarization is
    # done inside the kernel).  TODO(synk): for a real model, reshape once per model.
    wmat = jnp.transpose(weight, (0, 2, 3, 1)).reshape(cout, kk * cin).astype(jnp.float32)

    # Per-tap flat-spatial shifts + pre-broadcast {0,1} boundary masks.
    shifts = tuple((ky - pad) * w + (kx - pad) for ky in range(k) for kx in range(k))
    hh, ww = np.meshgrid(np.arange(h), np.arange(w), indexing="ij")
    base = np.stack([((hh + (ky - pad) >= 0) & (hh + (ky - pad) < h) &
                      (ww + (kx - pad) >= 0) & (ww + (kx - pad) < w)).reshape(s)
                     for ky in range(k) for kx in range(k)])            # (kk, S)
    masks = np.tile(np.repeat(base, cin, axis=0), (1, nb))              # (kk*Cin, nb*S)
    masks = jnp.asarray(masks, dtype=cdtype)

    x_flat = x_nchw.reshape(n, cin, s)                                  # free view (NCHW)

    kernel = functools.partial(_hard_binary_conv_kernel, shifts=shifts,
                               sign_mode=sign_mode, inv_temp=inv_temp, cdtype=cdtype)

    out = pl.pallas_call(
        kernel,
        out_shape=jax.ShapeDtypeStruct((n, cout, s), x_nchw.dtype),
        grid_spec=pltpu.PrefetchScalarGridSpec(
            num_scalar_prefetch=0,
            grid=(n // nb,),
            in_specs=[
                pl.BlockSpec((nb, cin, s), lambda i: (i, 0, 0)),        # activations
                pl.BlockSpec((cout, kk * cin), lambda i: (0, 0)),       # raw weights
                pl.BlockSpec((kk * cin, nb * s), lambda i: (0, 0)),     # boundary masks
            ],
            out_specs=pl.BlockSpec((nb, cout, s), lambda i: (i, 0, 0)),
            scratch_shapes=[
                pltpu.VMEM((cin, nb * s), cdtype),                      # batch-on-lanes x
                pltpu.VMEM((kk * cin, nb * s), cdtype),                 # im2col slab
                pltpu.VMEM((cout, nb * s), jnp.float32),                # matmul result
            ],
        ),
        compiler_params=pltpu.CompilerParams(
            dimension_semantics=("parallel",),                          # batch blocks indep.
            vmem_limit_bytes=vmem_limit),
    )(x_flat, wmat, masks)
    return out.reshape(n, cout, h, w)                                   # free view to NCHW


# ---------------------------------------------------------------------------
# Pure-JAX reference (eval-mode HardBinaryConv.forward)
# ---------------------------------------------------------------------------
def hard_binary_conv_ref(x, weight, temperature=1.0):
    k = weight.shape[-1]
    pad = k // 2
    t = float(temperature)
    bw = jnp.sign(weight) if t < 1e-7 else jnp.clip(weight / max(t, 1e-8), -1.0, 1.0)
    return lax.conv_general_dilated(
        x, bw, window_strides=(1, 1), padding=[(pad, pad), (pad, pad)],
        dimension_numbers=("NCHW", "OIHW", "NCHW"),
        precision=lax.Precision.HIGHEST)


# ---------------------------------------------------------------------------
if __name__ == "__main__":
    key = jax.random.PRNGKey(0)
    kx, kw1, kw2, kw3 = jax.random.split(key, 4)

    # HardBinaryConv(in_chn=16, out_chn=32, kernel_size=3, stride=1, padding=1)
    N, Cin, H, W = 2, 16, 16, 16
    Cout = 32
    x = jax.random.normal(kx, (N, Cin, H, W), jnp.float32)              # NCHW like PyTorch

    # 1) module's own init scale (randn * 0.001), temperature = 1 (clamp inert)
    w3 = 0.001 * jax.random.normal(kw1, (Cout, Cin, 3, 3), jnp.float32)
    out3 = jax.block_until_ready(hard_binary_conv(x, w3, temperature=1.0))
    assert out3.shape == (N, Cout, H, W)
    np.testing.assert_allclose(np.asarray(out3),
                               np.asarray(hard_binary_conv_ref(x, w3, 1.0)),
                               rtol=5e-4, atol=5e-5)

    # 2) larger weights + temperature=0.5 so clamp(w/temp, -1, 1) actually clips
    w3b = 0.7 * jax.random.normal(kw2, (Cout, Cin, 3, 3), jnp.float32)
    out3b = jax.block_until_ready(hard_binary_conv(x, w3b, temperature=0.5))
    np.testing.assert_allclose(np.asarray(out3b),
                               np.asarray(hard_binary_conv_ref(x, w3b, 0.5)),
                               rtol=5e-4, atol=5e-5)

    # 3) 1x1 kernel, temperature < 1e-7 -> sign(weight) binarization branch
    w1 = 1.5 * jax.random.normal(kw3, (Cout, Cin, 1, 1), jnp.float32)
    out1 = jax.block_until_ready(hard_binary_conv(x, w1, temperature=1e-9))
    np.testing.assert_allclose(np.asarray(out1),
                               np.asarray(hard_binary_conv_ref(x, w1, 1e-9)),
                               rtol=5e-4, atol=5e-5)

    # 4) bf16 MXU path (sign branch: binary weights are exactly +-1 in bf16); compare
    #    against the reference fed with bf16-quantized activations.
    out_bf = jax.block_until_ready(
        hard_binary_conv(x, w3b, temperature=1e-9, compute_dtype=jnp.bfloat16))
    x_q = x.astype(jnp.bfloat16).astype(jnp.float32)
    np.testing.assert_allclose(np.asarray(out_bf),
                               np.asarray(hard_binary_conv_ref(x_q, w3b, 1e-9)),
                               rtol=2e-3, atol=2e-3)

    print("KERNEL_OK")
</pallas_src>

<mosaic_0001>
module attributes {stable_mosaic.version = 11 : i64} {
  func.func @_hard_binary_conv_kernel(%arg0: i32, %arg1: memref<1x16x256xf32, #tpu.memory_space<vmem>>, %arg2: memref<32x144xf32, #tpu.memory_space<vmem>>, %arg3: memref<144x256xf32, #tpu.memory_space<vmem>>, %arg4: memref<1x32x256xf32, #tpu.memory_space<vmem>>, %arg5: memref<16x256xf32, #tpu.memory_space<vmem>>, %arg6: memref<144x256xf32, #tpu.memory_space<vmem>>, %arg7: memref<32x256xf32, #tpu.memory_space<vmem>>) attributes {dimension_semantics = [#tpu.dimension_semantics<parallel>], iteration_bounds = array<i64: 2>, scalar_prefetch = 0 : i64, scratch_operands = 3 : i64, tpu.core_type = #tpu.core_type<tc>, window_params = [{transform_indices = @transform_0, window_bounds = array<i64: 1, 16, 256>}, {pipeline_mode = #tpu.pipeline_mode<synchronous>, transform_indices = @transform_1, window_bounds = array<i64: 32, 144>}, {pipeline_mode = #tpu.pipeline_mode<synchronous>, transform_indices = @transform_2, window_bounds = array<i64: 144, 256>}, {transform_indices = @transform_3, window_bounds = array<i64: 1, 32, 256>}]} {
    %c0 = arith.constant 0 : index
    %c0_0 = arith.constant 0 : index
    %0 = vector.load %arg2[%c0, %c0_0] : memref<32x144xf32, #tpu.memory_space<vmem>>, vector<32x144xf32>
    %cst = arith.constant 1.000000e+00 : f32
    %1 = vector.broadcast %cst : f32 to vector<32x144xf32>
    %2 = arith.mulf %0, %1 : vector<32x144xf32>
    %cst_1 = arith.constant -1.000000e+00 : f32
    %cst_2 = arith.constant 1.000000e+00 : f32
    %3 = vector.broadcast %cst_1 : f32 to vector<32x144xf32>
    %4 = arith.maximumf %3, %2 : vector<32x144xf32>
    %5 = vector.broadcast %cst_2 : f32 to vector<32x144xf32>
    %6 = arith.minimumf %5, %4 : vector<32x144xf32>
    %c0_3 = arith.constant 0 : index
    %c0_4 = arith.constant 0 : index
    %c0_5 = arith.constant 0 : index
    %7 = vector.load %arg1[%c0_3, %c0_4, %c0_5] : memref<1x16x256xf32, #tpu.memory_space<vmem>>, vector<1x16x256xf32>
    %8 = vector.shape_cast %7 : vector<1x16x256xf32> to vector<16x256xf32>
    %c0_6 = arith.constant 0 : index
    %c0_7 = arith.constant 0 : index
    %9 = vector.load %arg5[%c0_6, %c0_7] : memref<16x256xf32, #tpu.memory_space<vmem>>, vector<16x256xf32>
    tpu.vector_store %arg5[%c0_6, %c0_7], %8 {strides = array<i32>} : memref<16x256xf32, #tpu.memory_space<vmem>>, vector<16x256xf32>,
    %c0_8 = arith.constant 0 : index
    %c0_9 = arith.constant 0 : index
    %10 = vector.load %arg5[%c0_8, %c0_9] : memref<16x256xf32, #tpu.memory_space<vmem>>, vector<16x256xf32>
    %c17_i32 = arith.constant 17 : i32
    %11 = tpu.dynamic_rotate %10 by %c17_i32 dim 1 : vector<16x256xf32>, i32 -> vector<16x256xf32>
    %c0_10 = arith.constant 0 : index
    %c0_11 = arith.constant 0 : index
    %12 = vector.load %arg3[%c0_10, %c0_11] : memref<144x256xf32, #tpu.memory_space<vmem>>, vector<16x256xf32>
    %13 = arith.mulf %11, %12 : vector<16x256xf32>
    %c0_12 = arith.constant 0 : index
    %c0_13 = arith.constant 0 : index
    %14 = vector.load %arg6[%c0_12, %c0_13] : memref<144x256xf32, #tpu.memory_space<vmem>>, vector<16x256xf32>
    tpu.vector_store %arg6[%c0_12, %c0_13], %13 {strides = array<i32>} : memref<144x256xf32, #tpu.memory_space<vmem>>, vector<16x256xf32>,
    %c0_14 = arith.constant 0 : index
    %c0_15 = arith.constant 0 : index
    %15 = vector.load %arg5[%c0_14, %c0_15] : memref<16x256xf32, #tpu.memory_space<vmem>>, vector<16x256xf32>
    %c16_i32 = arith.constant 16 : i32
    %16 = tpu.dynamic_rotate %15 by %c16_i32 dim 1 : vector<16x256xf32>, i32 -> vector<16x256xf32>
    %c16 = arith.constant 16 : index
    %c0_16 = arith.constant 0 : index
    %17 = vector.load %arg3[%c16, %c0_16] : memref<144x256xf32, #tpu.memory_space<vmem>>, vector<16x256xf32>
    %18 = arith.mulf %16, %17 : vector<16x256xf32>
    %c16_17 = arith.constant 16 : index
    %c0_18 = arith.constant 0 : index
    %19 = vector.load %arg6[%c16_17, %c0_18] : memref<144x256xf32, #tpu.memory_space<vmem>>, vector<16x256xf32>
    tpu.vector_store %arg6[%c16_17, %c0_18], %18 {strides = array<i32>} : memref<144x256xf32, #tpu.memory_space<vmem>>, vector<16x256xf32>,
    %c0_19 = arith.constant 0 : index
    %c0_20 = arith.constant 0 : index
    %20 = vector.load %arg5[%c0_19, %c0_20] : memref<16x256xf32, #tpu.memory_space<vmem>>, vector<16x256xf32>
    %c15_i32 = arith.constant 15 : i32
    %21 = tpu.dynamic_rotate %20 by %c15_i32 dim 1 : vector<16x256xf32>, i32 -> vector<16x256xf32>
    %c32 = arith.constant 32 : index
    %c0_21 = arith.constant 0 : index
    %22 = vector.load %arg3[%c32, %c0_21] : memref<144x256xf32, #tpu.memory_space<vmem>>, vector<16x256xf32>
    %23 = arith.mulf %21, %22 : vector<16x256xf32>
    %c32_22 = arith.constant 32 : index
    %c0_23 = arith.constant 0 : index
    %24 = vector.load %arg6[%c32_22, %c0_23] : memref<144x256xf32, #tpu.memory_space<vmem>>, vector<16x256xf32>
    tpu.vector_store %arg6[%c32_22, %c0_23], %23 {strides = array<i32>} : memref<144x256xf32, #tpu.memory_space<vmem>>, vector<16x256xf32>,
    %c0_24 = arith.constant 0 : index
    %c0_25 = arith.constant 0 : index
    %25 = vector.load %arg5[%c0_24, %c0_25] : memref<16x256xf32, #tpu.memory_space<vmem>>, vector<16x256xf32>
    %c1_i32 = arith.constant 1 : i32
    %26 = tpu.dynamic_rotate %25 by %c1_i32 dim 1 : vector<16x256xf32>, i32 -> vector<16x256xf32>
    %c48 = arith.constant 48 : index
    %c0_26 = arith.constant 0 : index
    %27 = vector.load %arg3[%c48, %c0_26] : memref<144x256xf32, #tpu.memory_space<vmem>>, vector<16x256xf32>
    %28 = arith.mulf %26, %27 : vector<16x256xf32>
    %c48_27 = arith.constant 48 : index
    %c0_28 = arith.constant 0 : index
    %29 = vector.load %arg6[%c48_27, %c0_28] : memref<144x256xf32, #tpu.memory_space<vmem>>, vector<16x256xf32>
    tpu.vector_store %arg6[%c48_27, %c0_28], %28 {strides = array<i32>} : memref<144x256xf32, #tpu.memory_space<vmem>>, vector<16x256xf32>,
    %c0_29 = arith.constant 0 : index
    %c0_30 = arith.constant 0 : index
    %30 = vector.load %arg5[%c0_29, %c0_30] : memref<16x256xf32, #tpu.memory_space<vmem>>, vector<16x256xf32>
    %c64 = arith.constant 64 : index
    %c0_31 = arith.constant 0 : index
    %31 = vector.load %arg3[%c64, %c0_31] : memref<144x256xf32, #tpu.memory_space<vmem>>, vector<16x256xf32>
    %32 = arith.mulf %30, %31 : vector<16x256xf32>
    %c64_32 = arith.constant 64 : index
    %c0_33 = arith.constant 0 : index
    %33 = vector.load %arg6[%c64_32, %c0_33] : memref<144x256xf32, #tpu.memory_space<vmem>>, vector<16x256xf32>
    tpu.vector_store %arg6[%c64_32, %c0_33], %32 {strides = array<i32>} : memref<144x256xf32, #tpu.memory_space<vmem>>, vector<16x256xf32>,
    %c0_34 = arith.constant 0 : index
    %c0_35 = arith.constant 0 : index
    %34 = vector.load %arg5[%c0_34, %c0_35] : memref<16x256xf32, #tpu.memory_space<vmem>>, vector<16x256xf32>
    %c255_i32 = arith.constant 255 : i32
    %35 = tpu.dynamic_rotate %34 by %c255_i32 dim 1 : vector<16x256xf32>, i32 -> vector<16x256xf32>
    %c80 = arith.constant 80 : index
    %c0_36 = arith.constant 0 : index
    %36 = vector.load %arg3[%c80, %c0_36] : memref<144x256xf32, #tpu.memory_space<vmem>>, vector<16x256xf32>
    %37 = arith.mulf %35, %36 : vector<16x256xf32>
    %c80_37 = arith.constant 80 : index
    %c0_38 = arith.constant 0 : index
    %38 = vector.load %arg6[%c80_37, %c0_38] : memref<144x256xf32, #tpu.memory_space<vmem>>, vector<16x256xf32>
    tpu.vector_store %arg6[%c80_37, %c0_38], %37 {strides = array<i32>} : memref<144x256xf32, #tpu.memory_space<vmem>>, vector<16x256xf32>,
    %c0_39 = arith.constant 0 : index
    %c0_40 = arith.constant 0 : index
    %39 = vector.load %arg5[%c0_39, %c0_40] : memref<16x256xf32, #tpu.memory_space<vmem>>, vector<16x256xf32>
    %c241_i32 = arith.constant 241 : i32
    %40 = tpu.dynamic_rotate %39 by %c241_i32 dim 1 : vector<16x256xf32>, i32 -> vector<16x256xf32>
    %c96 = arith.constant 96 : index
    %c0_41 = arith.constant 0 : index
    %41 = vector.load %arg3[%c96, %c0_41] : memref<144x256xf32, #tpu.memory_space<vmem>>, vector<16x256xf32>
    %42 = arith.mulf %40, %41 : vector<16x256xf32>
    %c96_42 = arith.constant 96 : index
    %c0_43 = arith.constant 0 : index
    %43 = vector.load %arg6[%c96_42, %c0_43] : memref<144x256xf32, #tpu.memory_space<vmem>>, vector<16x256xf32>
    tpu.vector_store %arg6[%c96_42, %c0_43], %42 {strides = array<i32>} : memref<144x256xf32, #tpu.memory_space<vmem>>, vector<16x256xf32>,
    %c0_44 = arith.constant 0 : index
    %c0_45 = arith.constant 0 : index
    %44 = vector.load %arg5[%c0_44, %c0_45] : memref<16x256xf32, #tpu.memory_space<vmem>>, vector<16x256xf32>
    %c240_i32 = arith.constant 240 : i32
    %45 = tpu.dynamic_rotate %44 by %c240_i32 dim 1 : vector<16x256xf32>, i32 -> vector<16x256xf32>
    %c112 = arith.constant 112 : index
    %c0_46 = arith.constant 0 : index
    %46 = vector.load %arg3[%c112, %c0_46] : memref<144x256xf32, #tpu.memory_space<vmem>>, vector<16x256xf32>
    %47 = arith.mulf %45, %46 : vector<16x256xf32>
    %c112_47 = arith.constant 112 : index
    %c0_48 = arith.constant 0 : index
    %48 = vector.load %arg6[%c112_47, %c0_48] : memref<144x256xf32, #tpu.memory_space<vmem>>, vector<16x256xf32>
    tpu.vector_store %arg6[%c112_47, %c0_48], %47 {strides = array<i32>} : memref<144x256xf32, #tpu.memory_space<vmem>>, vector<16x256xf32>,
    %c0_49 = arith.constant 0 : index
    %c0_50 = arith.constant 0 : index
    %49 = vector.load %arg5[%c0_49, %c0_50] : memref<16x256xf32, #tpu.memory_space<vmem>>, vector<16x256xf32>
    %c239_i32 = arith.constant 239 : i32
    %50 = tpu.dynamic_rotate %49 by %c239_i32 dim 1 : vector<16x256xf32>, i32 -> vector<16x256xf32>
    %c128 = arith.constant 128 : index
    %c0_51 = arith.constant 0 : index
    %51 = vector.load %arg3[%c128, %c0_51] : memref<144x256xf32, #tpu.memory_space<vmem>>, vector<16x256xf32>
    %52 = arith.mulf %50, %51 : vector<16x256xf32>
    %c128_52 = arith.constant 128 : index
    %c0_53 = arith.constant 0 : index
    %53 = vector.load %arg6[%c128_52, %c0_53] : memref<144x256xf32, #tpu.memory_space<vmem>>, vector<16x256xf32>
    tpu.vector_store %arg6[%c128_52, %c0_53], %52 {strides = array<i32>} : memref<144x256xf32, #tpu.memory_space<vmem>>, vector<16x256xf32>,
    %c0_54 = arith.constant 0 : index
    %c0_55 = arith.constant 0 : index
    %54 = vector.load %arg6[%c0_54, %c0_55] : memref<144x256xf32, #tpu.memory_space<vmem>>, vector<144x256xf32>
    %cst_56 = arith.constant dense<0.000000e+00> : vector<32x256xf32>
    %55 = tpu.matmul %6, %54, %cst_56 {dimension_numbers = #tpu.dot_dimension_numbers<[1], [0], [0], [1], [0, 0, 1, 1], [], []>} : vector<32x144xf32>, vector<144x256xf32>, vector<32x256xf32> -> vector<32x256xf32>
    %c0_57 = arith.constant 0 : index
    %c0_58 = arith.constant 0 : index
    %56 = vector.load %arg7[%c0_57, %c0_58] : memref<32x256xf32, #tpu.memory_space<vmem>>, vector<32x256xf32>
    tpu.vector_store %arg7[%c0_57, %c0_58], %55 {strides = array<i32>} : memref<32x256xf32, #tpu.memory_space<vmem>>, vector<32x256xf32>,
    %c0_59 = arith.constant 0 : index
    %c0_60 = arith.constant 0 : index
    %57 = vector.load %arg7[%c0_59, %c0_60] : memref<32x256xf32, #tpu.memory_space<vmem>>, vector<32x256xf32>
    %c0_61 = arith.constant 0 : index
    %c0_62 = arith.constant 0 : index
    %c0_63 = arith.constant 0 : index
    %58 = vector.load %arg4[%c0_61, %c0_62, %c0_63] : memref<1x32x256xf32, #tpu.memory_space<vmem>>, vector<1x32x256xf32>
    %59 = vector.shape_cast %58 : vector<1x32x256xf32> to vector<32x256xf32>
    %60 = vector.shape_cast %57 : vector<32x256xf32> to vector<1x32x256xf32>
    tpu.vector_store %arg4[%c0_61, %c0_62, %c0_63], %60 {strides = array<i32>} : memref<1x32x256xf32, #tpu.memory_space<vmem>>, vector<1x32x256xf32>,
    return
  }
  func.func @transform_0(%arg0: i32) -> (i32, i32, i32) {
    %c0_i32 = arith.constant 0 : i32
    %c0_i32_0 = arith.constant 0 : i32
    %c0_i32_1 = arith.constant 0 : i32
    return %arg0, %c0_i32, %c0_i32_0 : i32, i32, i32
  }
  func.func @transform_1(%arg0: i32) -> (i32, i32) {
    %c0_i32 = arith.constant 0 : i32
    %c0_i32_0 = arith.constant 0 : i32
    %c0_i32_1 = arith.constant 0 : i32
    return %c0_i32, %c0_i32_0 : i32, i32
  }
  func.func @transform_2(%arg0: i32) -> (i32, i32) {
    %c0_i32 = arith.constant 0 : i32
    %c0_i32_0 = arith.constant 0 : i32
    %c0_i32_1 = arith.constant 0 : i32
    return %c0_i32, %c0_i32_0 : i32, i32
  }
  func.func @transform_3(%arg0: i32) -> (i32, i32, i32) {
    %c0_i32 = arith.constant 0 : i32
    %c0_i32_0 = arith.constant 0 : i32
    %c0_i32_1 = arith.constant 0 : i32
    return %arg0, %c0_i32, %c0_i32_0 : i32, i32, i32
  }
}

</mosaic_0001>

<bundles_post_ra>
// kernel: hard_binary_conv.1
= control target key start
LH: loop header
LB: loop body
LE: loop exit
PB: predicated region body
PF: predicated region fallthrough
CT: control target
= control target key end

     0   :  { %s783_s12 = smov 0   ;;  %s1050_s0 = inlined_call_operand.vmem [shape: f32[2,16,256], index: 0, kind: input, shape index: {}]   ;;  %s1051_s1 = inlined_call_operand.vmem [shape: f32[32,144], index: 1, kind: input, shape index: {}]   ;;  %s1052_s2 = inlined_call_operand.vmem [shape: f32[144,256], index: 2, kind: input, shape index: {}]   ;;  %s1053_s3 = inlined_call_operand.vmem [shape: f32[2,32,256], index: 3, kind: output, shape index: {}]  }
   0x1 LB: > { %s670_s13 = sadd.s32 4294967295, %s753_s12   ;;  %p674_p0 = scmp.ge.s32.totalorder %s753_s12, 1  ;;  %s753_s12 = sphi %s783_s12, %s13_s12  }
   0x2   : > { %p137_p1 = scmp.lt.s32.totalorder %s753_s12, 3 }
   0x4   : > { %p138_p2 = pnand %p674_p0, %p137_p1 }
   0x5   : > { %p161_p3 = scmp.lt.s32.totalorder (!%p138_p2), %s670_s13, 1  ;;  %s755_s18 = smov (!%p138_p2), 112  }
   0x6   : > { %141 = sbr.rel (%p138_p2) target bundleno = 395 (0x18b), region = 32  ;;  %s756_s19 = smov (!%p138_p2), 113  }
   0x7   : > { %s757_s20 = smov (!%p138_p2), 127   ;;  %s758_s21 = smov (!%p138_p2), 1  }
   0x8   : > { %s759_s22 = smov (!%p138_p2), 15   ;;  %s760_s23 = smov (!%p138_p2), 16  }
   0x9   : > { %s761_s24 = smov (!%p138_p2), 17   ;;  %s762_s29 = smov (!%p138_p2), 111  }
   0xb   : > { %s1055_s13 = smov (!%p161_p3, %s670_s13), 1  ;;  %v172_v4 = vld [vmem:[%s1051_s1 + $0x8] sm:$0xff]  ;;  %vm489_vm0 = vcmask 130048   ;;  %v215_v8 = vlaneseq  ;;  %v415_v12 = vld [vmem:[%s1052_s2 + $0xf8] sm:$0xff]  ;;  %v414_v13 = vld [vmem:[%s1052_s2 + $0xf0] sm:$0xff] }
   0xc   : > { %s693_s14 = sshll.u32 %s1055_s13, 5  ;;  %v176_v5 = vld [vmem:[%s1051_s1 + $0x28] sm:$0xff]  ;;  %v680_v6 = vclamps-f32 %v172_v4, 1.0  ;;  %v412_v20 = vld [vmem:[%s1052_s2 + $0xe0] sm:$0xff]  ;;  %v385_v24 = vld [vmem:[%s1052_s2 + $0xd0] sm:$0xff] }
   0xd   : > { %s165_s17 = scalar_lea.vmem %s1050_s0, %s693_s14  ;;  %v684_v7 = vclamps-f32 %v176_v5, 1.0  ;;  %v845_v9 = vand.u32 127, %v215_v8  ;;  %v413_v18 = vld [vmem:[%s1052_s2 + $0xe8] sm:$0xff]  ;;  %v386_v25 = vld [vmem:[%s1052_s2 + $0xd8] sm:$0xff]  ;;  %v383_v34 = vld [vmem:[%s1052_s2 + $0xc0] sm:$0xff]  ;;  %s694_s14 = sshll.u32 %s1055_s13, 6 }
   0xe   : > { %v797_v0 = vld [vmem:[%s165_s17 + $0x10] sm:$0xff]  ;;  %v799_v1 = vld [vmem:[%s165_s17] sm:$0xff]  ;;  %v803_v2 = vld [vmem:[%s165_s17 + $0x18] sm:$0xff]  ;;  %687 = vmatprep.mubr.msk.f32.mxu0 %vm489_vm0, %v680_v6 }
   0xf   : > { %401 = vrot.lane.b32.xlu0 %v797_v0, %s755_s18  ;;  %399 = vrot.lane.b32.xlu1 %v799_v1, %s755_s18  ;;  %v805_v3 = vld [vmem:[%s165_s17 + $0x8] sm:$0xff]  ;;  %vm407_vm1 = vcmp.lt.s32.totalorder %v845_v9, 112  ;;  %vm378_vm2 = vcmp.lt.s32.totalorder %v845_v9, 113  ;;  %vm349_vm3 = vcmp.lt.s32.totalorder %v845_v9, 127  ;;  %v356_v42 = vld [vmem:[%s1052_s2 + $0xb0] sm:$0xff]  ;;  %vm304_vm4 = vcmp.lt.s32.totalorder %v845_v9, 1  ;;  %s170_s17 = scalar_lea.vmem %s1053_s3, %s694_s14 }
  0x10   : > { %689 = vmatprep.mubr.msk.f32.mxu1 %vm489_vm0, %v684_v7  ;;  %v384_v35 = vld [vmem:[%s1052_s2 + $0xc8] sm:$0xff]  ;;  %v357_v43 = vld [vmem:[%s1052_s2 + $0xb8] sm:$0xff]  ;;  %v354_v50 = vld [vmem:[%s1052_s2 + $0xa0] sm:$0xff]  ;;  %vm275_vm5 = vcmp.lt.s32.totalorder %v845_v9, 15  ;;  %vm246_vm6 = vcmp.lt.s32.totalorder %v845_v9, 16  ;;  %vm217_vm7 = vcmp.lt.s32.totalorder %v845_v9, 17 }
  0x11   : > { %v355_v51 = vld [vmem:[%s1052_s2 + $0xa8] sm:$0xff]  ;;  %v328_v52 = vld [vmem:[%s1052_s2 + $0x98] sm:$0xff]  ;;  %v327_v55 = vld [vmem:[%s1052_s2 + $0x90] sm:$0xff]  ;;  %vm436_vm8 = vcmp.lt.s32.totalorder %v845_v9, 111 }
  0x12   : > { %v326_v58 = vld [vmem:[%s1052_s2 + $0x88] sm:$0xff]  ;;  %v332_v61 = vmul.f32 %v328_v52, %v803_v2  ;;  %v325_v62 = vld [vmem:[%s1052_s2 + $0x80] sm:$0xff]  ;;  %v331_v63 = vmul.f32 %v327_v55, %v797_v0  ;;  %v312_v7 = vld [vmem:[%s1052_s2 + $0x78] sm:$0xff] }
  0x13   : > { %405 = vrot.lane.b32.xlu0 %v803_v2, %s755_s18  ;;  %403 = vrot.lane.b32.xlu1 %v805_v3, %s755_s18  ;;  %v330_v6 = vmul.f32 %v326_v58, %v805_v3  ;;  %v225_v52 = vld [vmem:[%s1052_s2 + $0x18] sm:$0xff] }
  0x17   : > { %372 = vrot.lane.b32.xlu0 %v797_v0, %s756_s19  ;;  %376 = vrot.lane.b32.xlu1 %v803_v2, %s756_s19 }
  0x1b   : > { %370 = vrot.lane.b32.xlu0 %v799_v1, %s756_s19  ;;  %374 = vrot.lane.b32.xlu1 %v805_v3, %s756_s19 }
  0x1f   : > { %343 = vrot.lane.b32.xlu0 %v797_v0, %s757_s20  ;;  %347 = vrot.lane.b32.xlu1 %v803_v2, %s757_s20 }
  0x23   : > { %341 = vrot.lane.b32.xlu0 %v799_v1, %s757_s20  ;;  %345 = vrot.lane.b32.xlu1 %v805_v3, %s757_s20 }
  0x27   : > { %298 = vrot.lane.b32.xlu0 %v797_v0, %s758_s21  ;;  %302 = vrot.lane.b32.xlu1 %v803_v2, %s758_s21 }
  0x2b   : > { %296 = vrot.lane.b32.xlu0 %v799_v1, %s758_s21  ;;  %300 = vrot.lane.b32.xlu1 %v805_v3, %s758_s21 }
  0x2f   : > { %269 = vrot.lane.b32.xlu0 %v797_v0, %s759_s22  ;;  %273 = vrot.lane.b32.xlu1 %v803_v2, %s759_s22 }
  0x33   : > { %267 = vrot.lane.b32.xlu0 %v799_v1, %s759_s22  ;;  %271 = vrot.lane.b32.xlu1 %v805_v3, %s759_s22 }
  0x37   : > { %240 = vrot.lane.b32.xlu0 %v797_v0, %s760_s23  ;;  %244 = vrot.lane.b32.xlu1 %v803_v2, %s760_s23 }
  0x3b   : > { %238 = vrot.lane.b32.xlu0 %v799_v1, %s760_s23  ;;  %242 = vrot.lane.b32.xlu1 %v805_v3, %s760_s23 }
  0x3f   : > { %209 = vrot.lane.b32.xlu0 %v797_v0, %s761_s24  ;;  %213 = vrot.lane.b32.xlu1 %v803_v2, %s761_s24 }
  0x43   : > { %207 = vrot.lane.b32.xlu0 %v799_v1, %s761_s24  ;;  %211 = vrot.lane.b32.xlu1 %v805_v3, %s761_s24 }
  0x47   : > { %430 = vrot.lane.b32.xlu0 %v797_v0, %s762_s29  ;;  %434 = vrot.lane.b32.xlu1 %v803_v2, %s762_s29  ;;  %v329_v2 = vmul.f32 %v325_v62, %v799_v1  ;;  %v311_v0 = vld [vmem:[%s1052_s2 + $0x70] sm:$0xff] }
  0x4b   : > { %428 = vrot.lane.b32.xlu0 %v799_v1, %s762_s29  ;;  %432 = vrot.lane.b32.xlu1 %v805_v3, %s762_s29  ;;  %v309_v3 = vld [vmem:[%s1052_s2 + $0x60] sm:$0xff] }
  0x81   : > { %v402_v10 = vpop.permute.xlu0 %401  ;;  %v400_v11 = vpop.permute.xlu1 %399 }
  0x85   : > { %v406_v14 = vpop.permute.xlu0 %405  ;;  %v404_v15 = vpop.permute.xlu1 %403 }
  0x86   : > { %v409_v16 = vsel %vm407_vm1, %v402_v10, %v406_v14  ;;  %v411_v17 = vsel %vm407_vm1, %v406_v14, %v402_v10  ;;  %v410_v19 = vsel %vm407_vm1, %v404_v15, %v400_v11  ;;  %v408_v21 = vsel %vm407_vm1, %v400_v11, %v404_v15  ;;  %v310_v11 = vld [vmem:[%s1052_s2 + $0x68] sm:$0xff] }
  0x87   : > { %v419_v22 = vmul.f32 %v415_v12, %v411_v17  ;;  %v418_v23 = vmul.f32 %v414_v13, %v409_v16  ;;  %v417_v26 = vmul.f32 %v413_v18, %v410_v19  ;;  %v416_v29 = vmul.f32 %v412_v20, %v408_v21  ;;  %v282_v19 = vld [vmem:[%s1052_s2 + $0x50] sm:$0xff]  ;;  %v283_v20 = vld [vmem:[%s1052_s2 + $0x58] sm:$0xff] }
  0x89   : > { %502 = vmatprep.subr.mxu0 %v419_v22  ;;  %695 = vmatprep.subr.mxu1 %v419_v22  ;;  %v373_v27 = vpop.permute.xlu0 %372  ;;  %v377_v28 = vpop.permute.xlu1 %376 }
  0x8a   : > { %v380_v30 = vsel %vm378_vm2, %v373_v27, %v377_v28  ;;  %v382_v31 = vsel %vm378_vm2, %v377_v28, %v373_v27  ;;  %503 = vmatpush1.msra.mxu0 %v418_v23  ;;  %713 = vmatpush1.msra.mxu1 %v418_v23  ;;  %v280_v27 = vld [vmem:[%s1052_s2 + $0x40] sm:$0xff]  ;;  %v281_v28 = vld [vmem:[%s1052_s2 + $0x48] sm:$0xff] }
  0x8b   : > { %v389_v32 = vmul.f32 %v385_v24, %v380_v30  ;;  %v390_v33 = vmul.f32 %v386_v25, %v382_v31  ;;  %504 = vmatprep.subr.mxu0 %v417_v26  ;;  %696 = vmatprep.subr.mxu1 %v417_v26 }
  0x8c   : > { %505 = vmatpush1.msra.mxu0 %v416_v29  ;;  %714 = vmatpush1.msra.mxu1 %v416_v29 }
  0x8d   : > { %v371_v36 = vpop.permute.xlu0 %370  ;;  %506 = vmatprep.subr.mxu0 %v390_v33  ;;  %697 = vmatprep.subr.mxu1 %v390_v33  ;;  %v375_v37 = vpop.permute.xlu1 %374 }
  0x8e   : > { %v379_v38 = vsel %vm378_vm2, %v371_v36, %v375_v37  ;;  %v381_v39 = vsel %vm378_vm2, %v375_v37, %v371_v36  ;;  %507 = vmatpush1.msra.mxu0 %v389_v32  ;;  %715 = vmatpush1.msra.mxu1 %v389_v32  ;;  %v254_v36 = vld [vmem:[%s1052_s2 + $0x38] sm:$0xff] }
  0x8f   : > { %v387_v40 = vmul.f32 %v383_v34, %v379_v38  ;;  %v388_v41 = vmul.f32 %v384_v35, %v381_v39  ;;  %v253_v35 = vld [vmem:[%s1052_s2 + $0x30] sm:$0xff] }
  0x91   : > { %v344_v44 = vpop.permute.xlu0 %343  ;;  %508 = vmatprep.subr.mxu0 %v388_v41  ;;  %698 = vmatprep.subr.mxu1 %v388_v41  ;;  %v348_v45 = vpop.permute.xlu1 %347 }
  0x92   : > { %v351_v46 = vsel %vm349_vm3, %v344_v44, %v348_v45  ;;  %v353_v47 = vsel %vm349_vm3, %v348_v45, %v344_v44  ;;  %509 = vmatpush1.msra.mxu0 %v387_v40  ;;  %716 = vmatpush1.msra.mxu1 %v387_v40  ;;  %v252_v44 = vld [vmem:[%s1052_s2 + $0x28] sm:$0xff] }
  0x93   : > { %v360_v48 = vmul.f32 %v356_v42, %v351_v46  ;;  %v361_v49 = vmul.f32 %v357_v43, %v353_v47  ;;  %v251_v43 = vld [vmem:[%s1052_s2 + $0x20] sm:$0xff] }
  0x95   : > { %v342_v53 = vpop.permute.xlu0 %341  ;;  %510 = vmatprep.subr.mxu0 %v361_v49  ;;  %699 = vmatprep.subr.mxu1 %v361_v49  ;;  %v346_v54 = vpop.permute.xlu1 %345 }
  0x96   : > { %v350_v56 = vsel %vm349_vm3, %v342_v53, %v346_v54  ;;  %v352_v57 = vsel %vm349_vm3, %v346_v54, %v342_v53  ;;  %511 = vmatpush1.msra.mxu0 %v360_v48  ;;  %717 = vmatpush1.msra.mxu1 %v360_v48 }
  0x97   : > { %v358_v59 = vmul.f32 %v354_v50, %v350_v56  ;;  %v359_v60 = vmul.f32 %v355_v51, %v352_v57  ;;  %v224_v51 = vld [vmem:[%s1052_s2 + $0x10] sm:$0xff] }
  0x99   : > { %v299_v4 = vpop.permute.xlu0 %298  ;;  %512 = vmatprep.subr.mxu0 %v359_v60  ;;  %700 = vmatprep.subr.mxu1 %v359_v60  ;;  %v303_v5 = vpop.permute.xlu1 %302  ;;  %v223_v60 = vld [vmem:[%s1052_s2 + $0x8] sm:$0xff] }
  0x9a   : > { %v306_v8 = vsel %vm304_vm4, %v299_v4, %v303_v5  ;;  %513 = vmatpush1.msra.mxu0 %v358_v59  ;;  %718 = vmatpush1.msra.mxu1 %v358_v59  ;;  %v308_v10 = vsel %vm304_vm4, %v303_v5, %v299_v4  ;;  %v222_v59 = vld [vmem:[%s1052_s2] sm:$0xff] }
  0x9b   : > { %514 = vmatprep.subr.mxu0 %v332_v61  ;;  %701 = vmatprep.subr.mxu1 %v332_v61  ;;  %v316_v1 = vmul.f32 %v312_v7, %v306_v8  ;;  %v315_v14 = vmul.f32 %v311_v0, %v308_v10  ;;  %v443_v7 = vld [vmem:[%s1052_s2 + $0x110] sm:$0xff]  ;;  %v444_v8 = vld [vmem:[%s1052_s2 + $0x118] sm:$0xff] }
  0x9c   : > { %515 = vmatpush1.msra.mxu0 %v331_v63  ;;  %719 = vmatpush1.msra.mxu1 %v331_v63 }
  0x9d   : > { %v297_v12 = vpop.permute.xlu0 %296  ;;  %516 = vmatprep.subr.mxu0 %v330_v6  ;;  %702 = vmatprep.subr.mxu1 %v330_v6  ;;  %v301_v13 = vpop.permute.xlu1 %300 }
  0x9e   : > { %v305_v15 = vsel %vm304_vm4, %v297_v12, %v301_v13  ;;  %v307_v16 = vsel %vm304_vm4, %v301_v13, %v297_v12  ;;  %517 = vmatpush1.msra.mxu0 %v329_v2  ;;  %720 = vmatpush1.msra.mxu1 %v329_v2  ;;  %v441_v12 = vld [vmem:[%s1052_s2 + $0x100] sm:$0xff]  ;;  %v442_v13 = vld [vmem:[%s1052_s2 + $0x108] sm:$0xff] }
  0x9f   : > { %v313_v17 = vmul.f32 %v309_v3, %v307_v16  ;;  %v314_v18 = vmul.f32 %v310_v11, %v305_v15  ;;  %518 = vmatprep.subr.mxu0 %v316_v1  ;;  %703 = vmatprep.subr.mxu1 %v316_v1  ;;  %v175_v15 = vld [vmem:[%s1051_s1 + $0x20] sm:$0xff] }
  0xa0   : > { %519 = vmatpush1.msra.mxu0 %v315_v14  ;;  %721 = vmatpush1.msra.mxu1 %v315_v14  ;;  %v171_v14 = vld [vmem:[%s1051_s1] sm:$0xff] }
  0xa1   : > { %v270_v21 = vpop.permute.xlu0 %269  ;;  %v274_v22 = vpop.permute.xlu1 %273  ;;  %520 = vmatprep.subr.mxu0 %v314_v18  ;;  %704 = vmatprep.subr.mxu1 %v314_v18  ;;  %v174_v18 = vld [vmem:[%s1051_s1 + $0x18] sm:$0xff] }
  0xa2   : > { %v277_v23 = vsel %vm275_vm5, %v270_v21, %v274_v22  ;;  %v279_v24 = vsel %vm275_vm5, %v274_v22, %v270_v21  ;;  %521 = vmatpush1.msra.mxu0 %v313_v17  ;;  %722 = vmatpush1.msra.mxu1 %v313_v17 }
  0xa3   : > { %v286_v25 = vmul.f32 %v282_v19, %v279_v24  ;;  %v287_v26 = vmul.f32 %v283_v20, %v277_v23  ;;  %v178_v19 = vld [vmem:[%s1051_s1 + $0x38] sm:$0xff]  ;;  %v679_v24 = vclamps-f32 %v171_v14, 1.0 }
  0xa5   : > { %v268_v29 = vpop.permute.xlu0 %267  ;;  %v272_v30 = vpop.permute.xlu1 %271  ;;  %522 = vmatprep.subr.mxu0 %v287_v26  ;;  %705 = vmatprep.subr.mxu1 %v287_v26  ;;  %v682_v26 = vclamps-f32 %v174_v18, 1.0 }
  0xa6   : > { %v276_v31 = vsel %vm275_vm5, %v268_v29, %v272_v30  ;;  %v278_v32 = vsel %vm275_vm5, %v272_v30, %v268_v29  ;;  %523 = vmatpush1.msra.mxu0 %v286_v25  ;;  %723 = vmatpush1.msra.mxu1 %v286_v25  ;;  %v683_v25 = vclamps-f32 %v175_v15, 1.0  ;;  %v177_v29 = vld [vmem:[%s1051_s1 + $0x30] sm:$0xff] }
  0xa7   : > { %v284_v33 = vmul.f32 %v280_v27, %v278_v32  ;;  %v285_v34 = vmul.f32 %v281_v28, %v276_v31  ;;  %v686_v27 = vclamps-f32 %v178_v19, 1.0  ;;  %v173_v28 = vld [vmem:[%s1051_s1 + $0x10] sm:$0xff]  ;;  %v685_v30 = vclamps-f32 %v177_v29, 1.0 }
  0xa8   : > { %v681_v9 = vclamps-f32 %v173_v28, 1.0 }
  0xa9   : > { %v241_v37 = vpop.permute.xlu0 %240  ;;  %v245_v38 = vpop.permute.xlu1 %244  ;;  %524 = vmatprep.subr.mxu0 %v285_v34  ;;  %706 = vmatprep.subr.mxu1 %v285_v34 }
  0xaa   : > { %v248_v39 = vsel %vm246_vm6, %v241_v37, %v245_v38  ;;  %v250_v40 = vsel %vm246_vm6, %v245_v38, %v241_v37  ;;  %525 = vmatpush1.msra.mxu0 %v284_v33  ;;  %724 = vmatpush1.msra.mxu1 %v284_v33 }
  0xab   : > { %v257_v41 = vmul.f32 %v253_v35, %v250_v40  ;;  %v258_v42 = vmul.f32 %v254_v36, %v248_v39 }
  0xad   : > { %v239_v45 = vpop.permute.xlu0 %238  ;;  %v243_v46 = vpop.permute.xlu1 %242  ;;  %526 = vmatprep.subr.mxu0 %v258_v42  ;;  %707 = vmatprep.subr.mxu1 %v258_v42 }
  0xae   : > { %v247_v47 = vsel %vm246_vm6, %v239_v45, %v243_v46  ;;  %v249_v48 = vsel %vm246_vm6, %v243_v46, %v239_v45  ;;  %527 = vmatpush1.msra.mxu0 %v257_v41  ;;  %725 = vmatpush1.msra.mxu1 %v257_v41 }
  0xaf   : > { %v255_v49 = vmul.f32 %v251_v43, %v249_v48  ;;  %v256_v50 = vmul.f32 %v252_v44, %v247_v47 }
  0xb1   : > { %v210_v53 = vpop.permute.xlu0 %209  ;;  %v214_v54 = vpop.permute.xlu1 %213  ;;  %528 = vmatprep.subr.mxu0 %v256_v50  ;;  %708 = vmatprep.subr.mxu1 %v256_v50 }
  0xb2   : > { %v219_v55 = vsel %vm217_vm7, %v210_v53, %v214_v54  ;;  %v221_v56 = vsel %vm217_vm7, %v214_v54, %v210_v53  ;;  %529 = vmatpush1.msra.mxu0 %v255_v49  ;;  %726 = vmatpush1.msra.mxu1 %v255_v49 }
  0xb3   : > { %v228_v57 = vmul.f32 %v224_v51, %v221_v56  ;;  %v229_v58 = vmul.f32 %v225_v52, %v219_v55 }
  0xb5   : > { %v208_v61 = vpop.permute.xlu0 %207  ;;  %v212_v62 = vpop.permute.xlu1 %211  ;;  %530 = vmatprep.subr.mxu0 %v229_v58  ;;  %709 = vmatprep.subr.mxu1 %v229_v58 }
  0xb6   : > { %v218_v63 = vsel %vm217_vm7, %v208_v61, %v212_v62  ;;  %v220_v4 = vsel %vm217_vm7, %v212_v62, %v208_v61  ;;  %531 = vmatpush1.msra.mxu0 %v228_v57  ;;  %727 = vmatpush1.msra.mxu1 %v228_v57 }
  0xb7   : > { %v226_v5 = vmul.f32 %v222_v59, %v220_v4  ;;  %v227_v6 = vmul.f32 %v223_v60, %v218_v63 }
  0xb9   : > { %v431_v2 = vpop.permute.xlu0 %430  ;;  %v435_v0 = vpop.permute.xlu1 %434  ;;  %532 = vmatprep.subr.mxu0 %v227_v6  ;;  %710 = vmatprep.subr.mxu1 %v227_v6 }
  0xba   : > { %v438_v10 = vsel %vm436_vm8, %v431_v2, %v435_v0  ;;  %v440_v3 = vsel %vm436_vm8, %v435_v0, %v431_v2  ;;  %533 = vmatpush1.msra.mxu0 %v226_v5  ;;  %728 = vmatpush1.msra.mxu1 %v226_v5 }
  0xbb   : > { %v447_v11 = vmul.f32 %v443_v7, %v438_v10  ;;  %v448_v1 = vmul.f32 %v444_v8, %v440_v3 }
  0xbd   : > { %v429_v16 = vpop.permute.xlu0 %428  ;;  %v433_v17 = vpop.permute.xlu1 %432  ;;  %562 = vmatprep.subr.mxu0 %v448_v1  ;;  %711 = vmatprep.subr.mxu1 %v448_v1 }
  0xbe   : > { %v437_v20 = vsel %vm436_vm8, %v429_v16, %v433_v17  ;;  %v439_v21 = vsel %vm436_vm8, %v433_v17, %v429_v16  ;;  %563 = vmatpush2.msra.mxu0 %v447_v11  ;;  %729 = vmatpush2.msra.mxu1 %v447_v11 }
  0xbf   : > { %v445_v22 = vmul.f32 %v441_v12, %v437_v20  ;;  %v446_v23 = vmul.f32 %v442_v13, %v439_v21 }
  0xc1   : > { %564 = vmatprep.subr.mxu0 %v446_v23  ;;  %712 = vmatprep.subr.mxu1 %v446_v23 }
  0xc2   : > { %565 = vmatpush2.msra.mxu0 %v445_v22  ;;  %730 = vmatpush2.msra.mxu1 %v445_v22 }
  0xc3   : > { %567 = vmatmul.mubr.f32.vlgmr.msra.gmra.mxu0 %v679_v24  ;;  %579 = vmatmul.mubr.f32.vlgmr.msra.gmra.mxu1 %v683_v25 }
  0xc4   : > { %688 = vmatprep.mubr.msk.f32.mxu0 %vm489_vm0, %v682_v26  ;;  %690 = vmatprep.mubr.msk.f32.mxu1 %vm489_vm0, %v686_v27 }
  0xc7   : > { %573 = vmatmul.mubr.f32.gmra.mxu0 %v681_v9  ;;  %585 = vmatmul.mubr.f32.gmra.mxu1 %v685_v30 }
 0x183   : > { %v568_v31 = vpop.f32.mrf.mxu0  ;;  %v580_v32 = vpop.f32.mrf.mxu1 }
 0x184   : > { %607 = vst [vmem:[%s170_s17] sm:$0xff] %v568_v31  ;;  %611 = vst [vmem:[%s170_s17 + $0x20] sm:$0xff] %v580_v32 }
 0x185   : > { %v570_v33 = vpop.f32.mrf.mxu0  ;;  %v582_v34 = vpop.f32.mrf.mxu1 }
 0x186   : > { %608 = vst [vmem:[%s170_s17 + $0x8] sm:$0xff] %v570_v33  ;;  %612 = vst [vmem:[%s170_s17 + $0x28] sm:$0xff] %v582_v34 }
 0x187   : > { %v574_v35 = vpop.f32.mrf.mxu0  ;;  %v586_v36 = vpop.f32.mrf.mxu1 }
 0x188   : > { %609 = vst [vmem:[%s170_s17 + $0x10] sm:$0xff] %v574_v35  ;;  %613 = vst [vmem:[%s170_s17 + $0x30] sm:$0xff] %v586_v36 }
 0x189   : > { %v576_v37 = vpop.f32.mrf.mxu0  ;;  %v588_v38 = vpop.f32.mrf.mxu1 }
 0x18a   : > { %610 = vst [vmem:[%s170_s17 + $0x18] sm:$0xff] %v576_v37  ;;  %614 = vst [vmem:[%s170_s17 + $0x38] sm:$0xff] %v588_v38 }
 0x18b PF: > { %s13_s12 = sadd.s32 1, %s753_s12  }
 0x18c   : > { %p10_p4 = scmp.ge.s32.totalorder %s13_s12, 4  }
 0x18e   :  { %12 = sbr.rel (!%p10_p4) target bundleno = 1 (0x1), region = 62 }

</bundles_post_ra>
